<compile_context>
chip_gen: v7x
topology: tpu7x:2x2x1
jax: 0.10.0
libtpu: 0.0.40
codegen_flags: <defaults>
</compile_context>

<pallas_src>
import jax
import jax.numpy as jnp
from jax import lax
from jax.experimental import pallas as pl
from jax.experimental.pallas import tpu as pltpu


def _projector_kernel(x_ref, stats_ref, wfold_ref, wstats_ref, b1_ref,
                      w2_ref, b2_ref, w3t_ref, yt_ref):
    # x_ref:     (tile_b, S*E)  bf16   flattened series tile
    # stats_ref: (tile_b, E)    bf16
    # wfold_ref: (S*E, H0p)     bf16   conv folded into first Linear
    # wstats_ref:(E,   H0p)     bf16   stats half of first Linear
    # b1/w2/b2/w3t:             f32    small resident weights
    # yt_ref:    (out_dim, tile_b) f32 lane-dense output (batch on lanes)

    # Layer 1: conv + cat + Linear fused into two bf16 MXU matmuls, f32 acc.
    h = jnp.dot(x_ref[...], wfold_ref[...], preferred_element_type=jnp.float32)
    h = h + jnp.dot(stats_ref[...], wstats_ref[...],
                    preferred_element_type=jnp.float32)
    h = jnp.maximum(h + b1_ref[...], 0.0)

    # Layer 2 (f32 x f32, tiny weights).
    h = jnp.maximum(
        jnp.dot(h, w2_ref[...], preferred_element_type=jnp.float32) + b2_ref[...],
        0.0)

    # Layer 3 (no bias): w3^T @ h^T so the result lands as (out_dim, tile_b)
    # with batch on lanes.  The rhs-dim-1 contraction may lower through an XLU
    # transpose of h; XLU is idle here (HBM-bound kernel) so it stays hidden.
    yt = lax.dot_general(w3t_ref[...], h,
                         dimension_numbers=(((1,), (1,)), ((), ())),
                         preferred_element_type=jnp.float32)
    yt_ref[...] = yt.astype(yt_ref.dtype)


def _round_up(n, m):
    return ((n + m - 1) // m) * m


def _choose_tile_and_vmem(B, SE, E, H0p, H1p, out_dim):
    """Pick a 128-aligned batch tile from the per-generation VMEM budget."""
    try:
        cap = int(pltpu.get_tpu_info().vmem_capacity_bytes)
    except Exception:
        cap = 64 * 1024 * 1024          # v7x per-TensorCore VMEM (most restrictive)
    budget = int(cap * 0.70)            # headroom for compiler scratch / spills

    act_bytes = 2                       # bf16 x / stats
    per_row = (2 * (SE + E) * act_bytes         # double-buffered x + stats rows
               + 2 * out_dim * 4                # double-buffered transposed output
               + (H0p + 2 * H1p) * 4)           # f32 h0, h1 (+ transposed copy)
    # Weights budgeted at 2 buffers (conservative: covers the fallback path
    # where pl.Buffered(1) is not honored).
    weight_bytes = (2 * (SE * H0p + E * H0p) * act_bytes
                    + 2 * (H0p + H1p + H0p * H1p + out_dim * H1p) * 4)
    avail = budget - weight_bytes - (2 << 20)

    tile_cap = max(128, min(4096, (avail // per_row) // 128 * 128))
    if B <= 256:
        tile = B                                        # single full-dim block
    else:
        # >= 2 grid steps (megacore on v7x), 128-aligned for lane-dense stores.
        tile = max(128, min(tile_cap, _round_up(pl.cdiv(B, 2), 128)))
    grid = pl.cdiv(B, tile)

    footprint = tile * per_row + weight_bytes + (4 << 20)
    vmem_limit = int(min(max(footprint, 32 * 1024 * 1024), int(cap * 0.9)))
    return tile, grid, vmem_limit
    # TODO(synk): for extreme S*E (huge enc_in*seq_len) add an "arbitrary"
    # K-grid axis with an f32 accumulator so x blocks stay bounded on v7x.


def projector_forward(x, stats, params):
    """x: (B, S, E) f32, stats: (B, 1, E) f32 -> (B, output_dim) f32."""
    wconv, w1, b1, w2, b2, w3 = params
    B, S, E = x.shape
    K = wconv.shape[1]
    H0 = w1.shape[1]
    H1 = w2.shape[1]
    out_dim = w3.shape[1]
    SE = S * E
    H0p = _round_up(H0, 128)
    H1p = _round_up(H1, 128)

    # --- trace-time algebra: fold the circular conv into the first Linear ---
    # conv[b, e] = sum_c sum_k wconv[c, k] * x[b, c, (e + k - 1) % E]
    # => conv @ w1[:E] == reshape(x, (B, S*E)) @ W_fold, with
    #    W_fold[c*E + e', h] = sum_k wconv[c, k] * w1[(e' - k + 1) % E, h]
    w1_conv = w1[:E, :]                        # (E, H0)
    w1_stats = w1[E:, :]                       # (E, H0)
    rolled = jnp.stack(
        [jnp.roll(w1_conv, shift=k - 1, axis=0) for k in range(K)], axis=0)  # (K,E,H0)
    w_fold = jnp.einsum('ck,keh->ceh', wconv, rolled).reshape(SE, H0)

    def pad_to(a, shape):
        return jnp.pad(a, [(0, t - s) for s, t in zip(a.shape, shape)])

    # Zero-pad hidden dims to lane width (free; keeps h tiles lane-dense).
    # bf16 only on the traffic-dominant operands; small weights/biases stay f32.
    w_fold_p = pad_to(w_fold, (SE, H0p)).astype(jnp.bfloat16)
    w1_stats_p = pad_to(w1_stats, (E, H0p)).astype(jnp.bfloat16)
    b1_p = pad_to(b1, (1, H0p)).astype(jnp.float32)
    w2_p = pad_to(w2, (H0p, H1p)).astype(jnp.float32)
    b2_p = pad_to(b2, (1, H1p)).astype(jnp.float32)
    w3_t = pad_to(w3.T, (out_dim, H1p)).astype(jnp.float32)

    x_flat = x.reshape(B, SE).astype(jnp.bfloat16)
    stats2d = stats.reshape(B, E).astype(jnp.bfloat16)

    tile, n_steps, vmem_limit = _choose_tile_and_vmem(B, SE, E, H0p, H1p, out_dim)

    def const_spec(shape, single_buffer):
        ndim = len(shape)
        index_map = lambda i: (0,) * ndim
        if single_buffer:
            return pl.BlockSpec(shape, index_map, pipeline_mode=pl.Buffered(1))
        return pl.BlockSpec(shape, index_map)

    def build(single_buffer_weights):
        return pl.pallas_call(
            _projector_kernel,
            out_shape=jax.ShapeDtypeStruct((out_dim, B), jnp.float32),
            grid_spec=pltpu.PrefetchScalarGridSpec(
                num_scalar_prefetch=0,
                grid=(n_steps,),
                in_specs=[
                    pl.BlockSpec((tile, SE), lambda i: (i, 0)),   # x tile
                    pl.BlockSpec((tile, E), lambda i: (i, 0)),    # stats tile
                    const_spec(w_fold_p.shape, single_buffer_weights),
                    const_spec(w1_stats_p.shape, single_buffer_weights),
                    const_spec(b1_p.shape, single_buffer_weights),
                    const_spec(w2_p.shape, single_buffer_weights),
                    const_spec(b2_p.shape, single_buffer_weights),
                    const_spec(w3_t.shape, single_buffer_weights),
                ],
                out_specs=pl.BlockSpec((out_dim, tile), lambda i: (0, i)),
            ),
            compiler_params=pltpu.CompilerParams(
                dimension_semantics=("parallel",),   # megacore-shardable batch
                vmem_limit_bytes=vmem_limit,
            ),
        )

    args = (x_flat, stats2d, w_fold_p, w1_stats_p, b1_p, w2_p, b2_p, w3_t)
    try:
        y_t = build(True)(*args)        # single-buffered resident weights
    except Exception:
        # pipeline_mode=pl.Buffered(1) not supported on this jax version:
        # fall back to default double-buffered weight blocks (previously
        # validated configuration).
        y_t = build(False)(*args)

    return y_t.T                                        # (B, out_dim)


def projector_reference(x, stats, params):
    """Pure-JAX f32 reference with the original (unfolded) module semantics."""
    wconv, w1, b1, w2, b2, w3 = params
    B, S, E = x.shape
    K = wconv.shape[1]
    x_pad = jnp.concatenate([x[:, :, -1:], x, x[:, :, :1]], axis=2)  # circular pad 1
    conv = jnp.zeros((B, E), jnp.float32)
    for k in range(K):
        conv = conv + jnp.einsum('bce,c->be', x_pad[:, :, k:k + E], wconv[:, k])
    feat = jnp.concatenate([conv, stats[:, 0, :]], axis=1)           # (B, 2E)
    h = jax.nn.relu(feat @ w1 + b1)
    h = jax.nn.relu(h @ w2 + b2)
    return h @ w3


def make_params(key, enc_in, seq_len, hidden_dims, output_dim, kernel_size=3):
    """Deterministic synthetic parameters (shapes match the PyTorch module)."""
    k = jax.random.split(key, 6)
    h0, h1 = hidden_dims
    # Conv1d weight (out=1, in=seq_len, K) -> stored as (seq_len, K)
    wconv = jax.random.normal(k[0], (seq_len, kernel_size), jnp.float32) / jnp.sqrt(
        seq_len * kernel_size)
    # Linear weights stored transposed: (in, out)
    w1 = jax.random.normal(k[1], (2 * enc_in, h0), jnp.float32) / jnp.sqrt(2 * enc_in)
    b1 = jax.random.normal(k[2], (1, h0), jnp.float32) * 0.01
    w2 = jax.random.normal(k[3], (h0, h1), jnp.float32) / jnp.sqrt(h0)
    b2 = jax.random.normal(k[4], (1, h1), jnp.float32) * 0.01
    w3 = jax.random.normal(k[5], (h1, output_dim), jnp.float32) / jnp.sqrt(h1)  # no bias
    return (wconv, w1, b1, w2, b2, w3)


def _run_case(key, B, S, E, hidden_dims, output_dim):
    kx, ks, kp = jax.random.split(key, 3)
    x = jax.random.normal(kx, (B, S, E), jnp.float32)
    stats = jax.random.normal(ks, (B, 1, E), jnp.float32)
    params = make_params(kp, E, S, hidden_dims, output_dim)

    y = jax.block_until_ready(projector_forward(x, stats, params))
    y_ref = projector_reference(x, stats, params)

    assert y.shape == (B, output_dim), (y.shape, (B, output_dim))
    # bf16 first-layer operands -> looser tolerance against the f32 reference.
    assert jnp.allclose(y, y_ref, atol=5e-2, rtol=5e-2), (B, y[:4], y_ref[:4])


if __name__ == "__main__":
    # Small shapes consistent with the module's forward:
    # batch=2, seq_len=8, enc_in=16, hidden_dims=[32, 32], output_dim=1.
    _run_case(jax.random.PRNGKey(0), B=2, S=8, E=16,
              hidden_dims=[32, 32], output_dim=1)

    # Multi-step grid + ragged last batch tile (exercises the no-pad path,
    # parallel grid sharding and single-buffered resident weights).
    _run_case(jax.random.PRNGKey(1), B=384, S=8, E=16,
              hidden_dims=[32, 32], output_dim=1)

    print("KERNEL_OK")
</pallas_src>

<mosaic_0001>
module attributes {stable_mosaic.version = 11 : i64} {
  func.func @_projector_kernel(%arg0: i32, %arg1: memref<2x128xbf16, #tpu.memory_space<vmem>>, %arg2: memref<2x16xbf16, #tpu.memory_space<vmem>>, %arg3: memref<128x128xbf16, #tpu.memory_space<vmem>>, %arg4: memref<16x128xbf16, #tpu.memory_space<vmem>>, %arg5: memref<1x128xf32, #tpu.memory_space<vmem>>, %arg6: memref<128x128xf32, #tpu.memory_space<vmem>>, %arg7: memref<1x128xf32, #tpu.memory_space<vmem>>, %arg8: memref<1x128xf32, #tpu.memory_space<vmem>>, %arg9: memref<1x2xf32, #tpu.memory_space<vmem>>) attributes {dimension_semantics = [#tpu.dimension_semantics<parallel>], iteration_bounds = array<i64: 1>, scalar_prefetch = 0 : i64, scratch_operands = 0 : i64, tpu.core_type = #tpu.core_type<tc>, window_params = [{transform_indices = @transform_0, window_bounds = array<i64: 2, 128>}, {transform_indices = @transform_1, window_bounds = array<i64: 2, 16>}, {pipeline_mode = #tpu.pipeline_mode<synchronous>, transform_indices = @transform_2, window_bounds = array<i64: 128, 128>}, {pipeline_mode = #tpu.pipeline_mode<synchronous>, transform_indices = @transform_3, window_bounds = array<i64: 16, 128>}, {pipeline_mode = #tpu.pipeline_mode<synchronous>, transform_indices = @transform_4, window_bounds = array<i64: 1, 128>}, {pipeline_mode = #tpu.pipeline_mode<synchronous>, transform_indices = @transform_5, window_bounds = array<i64: 128, 128>}, {pipeline_mode = #tpu.pipeline_mode<synchronous>, transform_indices = @transform_6, window_bounds = array<i64: 1, 128>}, {pipeline_mode = #tpu.pipeline_mode<synchronous>, transform_indices = @transform_7, window_bounds = array<i64: 1, 128>}, {transform_indices = @transform_8, window_bounds = array<i64: 1, 2>}]} {
    %c0 = arith.constant 0 : index
    %c0_0 = arith.constant 0 : index
    %0 = vector.load %arg1[%c0, %c0_0] : memref<2x128xbf16, #tpu.memory_space<vmem>>, vector<2x128xbf16>
    %c0_1 = arith.constant 0 : index
    %c0_2 = arith.constant 0 : index
    %1 = vector.load %arg3[%c0_1, %c0_2] : memref<128x128xbf16, #tpu.memory_space<vmem>>, vector<128x128xbf16>
    %cst = arith.constant dense<0.000000e+00> : vector<2x128xf32>
    %2 = tpu.matmul %0, %1, %cst {dimension_numbers = #tpu.dot_dimension_numbers<[1], [0], [0], [1], [0, 0, 1, 1], [], []>} : vector<2x128xbf16>, vector<128x128xbf16>, vector<2x128xf32> -> vector<2x128xf32>
    %c0_3 = arith.constant 0 : index
    %c0_4 = arith.constant 0 : index
    %3 = vector.load %arg2[%c0_3, %c0_4] : memref<2x16xbf16, #tpu.memory_space<vmem>>, vector<2x16xbf16>
    %c0_5 = arith.constant 0 : index
    %c0_6 = arith.constant 0 : index
    %4 = vector.load %arg4[%c0_5, %c0_6] : memref<16x128xbf16, #tpu.memory_space<vmem>>, vector<16x128xbf16>
    %cst_7 = arith.constant dense<0.000000e+00> : vector<2x128xf32>
    %5 = tpu.matmul %3, %4, %cst_7 {dimension_numbers = #tpu.dot_dimension_numbers<[1], [0], [0], [1], [0, 0, 1, 1], [], []>} : vector<2x16xbf16>, vector<16x128xbf16>, vector<2x128xf32> -> vector<2x128xf32>
    %6 = arith.addf %2, %5 : vector<2x128xf32>
    %c0_8 = arith.constant 0 : index
    %c0_9 = arith.constant 0 : index
    %7 = vector.load %arg5[%c0_8, %c0_9] : memref<1x128xf32, #tpu.memory_space<vmem>>, vector<1x128xf32>
    %8 = vector.broadcast %7 : vector<1x128xf32> to vector<2x128xf32>
    %9 = arith.addf %6, %8 : vector<2x128xf32>
    %cst_10 = arith.constant 0.000000e+00 : f32
    %10 = vector.broadcast %cst_10 : f32 to vector<2x128xf32>
    %11 = arith.maximumf %9, %10 : vector<2x128xf32>
    %c0_11 = arith.constant 0 : index
    %c0_12 = arith.constant 0 : index
    %12 = vector.load %arg6[%c0_11, %c0_12] : memref<128x128xf32, #tpu.memory_space<vmem>>, vector<128x128xf32>
    %cst_13 = arith.constant dense<0.000000e+00> : vector<2x128xf32>
    %13 = tpu.matmul %11, %12, %cst_13 {dimension_numbers = #tpu.dot_dimension_numbers<[1], [0], [0], [1], [0, 0, 1, 1], [], []>} : vector<2x128xf32>, vector<128x128xf32>, vector<2x128xf32> -> vector<2x128xf32>
    %c0_14 = arith.constant 0 : index
    %c0_15 = arith.constant 0 : index
    %14 = vector.load %arg7[%c0_14, %c0_15] : memref<1x128xf32, #tpu.memory_space<vmem>>, vector<1x128xf32>
    %15 = vector.broadcast %14 : vector<1x128xf32> to vector<2x128xf32>
    %16 = arith.addf %13, %15 : vector<2x128xf32>
    %cst_16 = arith.constant 0.000000e+00 : f32
    %17 = vector.broadcast %cst_16 : f32 to vector<2x128xf32>
    %18 = arith.maximumf %16, %17 : vector<2x128xf32>
    %c0_17 = arith.constant 0 : index
    %c0_18 = arith.constant 0 : index
    %19 = vector.load %arg8[%c0_17, %c0_18] : memref<1x128xf32, #tpu.memory_space<vmem>>, vector<1x128xf32>
    %cst_19 = arith.constant dense<0.000000e+00> : vector<1x2xf32>
    %20 = tpu.matmul %19, %18, %cst_19 {dimension_numbers = #tpu.dot_dimension_numbers<[1], [1], [0], [0], [0, 0, 1, 0], [], []>} : vector<1x128xf32>, vector<2x128xf32>, vector<1x2xf32> -> vector<1x2xf32>
    %c0_20 = arith.constant 0 : index
    %c0_21 = arith.constant 0 : index
    %21 = vector.load %arg9[%c0_20, %c0_21] : memref<1x2xf32, #tpu.memory_space<vmem>>, vector<1x2xf32>
    tpu.vector_store %arg9[%c0_20, %c0_21], %20 {strides = array<i32>} : memref<1x2xf32, #tpu.memory_space<vmem>>, vector<1x2xf32>,
    return
  }
  func.func @transform_0(%arg0: i32) -> (i32, i32) {
    %c0_i32 = arith.constant 0 : i32
    %c0_i32_0 = arith.constant 0 : i32
    return %arg0, %c0_i32 : i32, i32
  }
  func.func @transform_1(%arg0: i32) -> (i32, i32) {
    %c0_i32 = arith.constant 0 : i32
    %c0_i32_0 = arith.constant 0 : i32
    return %arg0, %c0_i32 : i32, i32
  }
  func.func @transform_2(%arg0: i32) -> (i32, i32) {
    %c0_i32 = arith.constant 0 : i32
    %c0_i32_0 = arith.constant 0 : i32
    %c0_i32_1 = arith.constant 0 : i32
    return %c0_i32, %c0_i32_0 : i32, i32
  }
  func.func @transform_3(%arg0: i32) -> (i32, i32) {
    %c0_i32 = arith.constant 0 : i32
    %c0_i32_0 = arith.constant 0 : i32
    %c0_i32_1 = arith.constant 0 : i32
    return %c0_i32, %c0_i32_0 : i32, i32
  }
  func.func @transform_4(%arg0: i32) -> (i32, i32) {
    %c0_i32 = arith.constant 0 : i32
    %c0_i32_0 = arith.constant 0 : i32
    %c0_i32_1 = arith.constant 0 : i32
    return %c0_i32, %c0_i32_0 : i32, i32
  }
  func.func @transform_5(%arg0: i32) -> (i32, i32) {
    %c0_i32 = arith.constant 0 : i32
    %c0_i32_0 = arith.constant 0 : i32
    %c0_i32_1 = arith.constant 0 : i32
    return %c0_i32, %c0_i32_0 : i32, i32
  }
  func.func @transform_6(%arg0: i32) -> (i32, i32) {
    %c0_i32 = arith.constant 0 : i32
    %c0_i32_0 = arith.constant 0 : i32
    %c0_i32_1 = arith.constant 0 : i32
    return %c0_i32, %c0_i32_0 : i32, i32
  }
  func.func @transform_7(%arg0: i32) -> (i32, i32) {
    %c0_i32 = arith.constant 0 : i32
    %c0_i32_0 = arith.constant 0 : i32
    %c0_i32_1 = arith.constant 0 : i32
    return %c0_i32, %c0_i32_0 : i32, i32
  }
  func.func @transform_8(%arg0: i32) -> (i32, i32) {
    %c0_i32 = arith.constant 0 : i32
    %c0_i32_0 = arith.constant 0 : i32
    return %c0_i32, %arg0 : i32, i32
  }
}

module attributes {stable_mosaic.version = 11 : i64} {
  func.func @_projector_kernel(%arg0: i32, %arg1: memref<2x128xbf16, #tpu.memory_space<vmem>>, %arg2: memref<2x16xbf16, #tpu.memory_space<vmem>>, %arg3: memref<128x128xbf16, #tpu.memory_space<vmem>>, %arg4: memref<16x128xbf16, #tpu.memory_space<vmem>>, %arg5: memref<1x128xf32, #tpu.memory_space<vmem>>, %arg6: memref<128x128xf32, #tpu.memory_space<vmem>>, %arg7: memref<1x128xf32, #tpu.memory_space<vmem>>, %arg8: memref<1x128xf32, #tpu.memory_space<vmem>>, %arg9: memref<1x2xf32, #tpu.memory_space<vmem>>) attributes {dimension_semantics = [#tpu.dimension_semantics<parallel>], iteration_bounds = array<i64: 1>, scalar_prefetch = 0 : i64, scratch_operands = 0 : i64, tpu.core_type = #tpu.core_type<tc>, window_params = [{transform_indices = @transform_0, window_bounds = array<i64: 2, 128>}, {transform_indices = @transform_1, window_bounds = array<i64: 2, 16>}, {pipeline_mode = #tpu.pipeline_mode<synchronous>, transform_indices = @transform_2, window_bounds = array<i64: 128, 128>}, {pipeline_mode = #tpu.pipeline_mode<synchronous>, transform_indices = @transform_3, window_bounds = array<i64: 16, 128>}, {pipeline_mode = #tpu.pipeline_mode<synchronous>, transform_indices = @transform_4, window_bounds = array<i64: 1, 128>}, {pipeline_mode = #tpu.pipeline_mode<synchronous>, transform_indices = @transform_5, window_bounds = array<i64: 128, 128>}, {pipeline_mode = #tpu.pipeline_mode<synchronous>, transform_indices = @transform_6, window_bounds = array<i64: 1, 128>}, {pipeline_mode = #tpu.pipeline_mode<synchronous>, transform_indices = @transform_7, window_bounds = array<i64: 1, 128>}, {transform_indices = @transform_8, window_bounds = array<i64: 1, 2>}]} {
    %c0 = arith.constant 0 : index
    %c0_0 = arith.constant 0 : index
    %0 = vector.load %arg1[%c0, %c0_0] : memref<2x128xbf16, #tpu.memory_space<vmem>>, vector<2x128xbf16>
    %c0_1 = arith.constant 0 : index
    %c0_2 = arith.constant 0 : index
    %1 = vector.load %arg3[%c0_1, %c0_2] : memref<128x128xbf16, #tpu.memory_space<vmem>>, vector<128x128xbf16>
    %cst = arith.constant dense<0.000000e+00> : vector<2x128xf32>
    %2 = tpu.matmul %0, %1, %cst {dimension_numbers = #tpu.dot_dimension_numbers<[1], [0], [0], [1], [0, 0, 1, 1], [], []>} : vector<2x128xbf16>, vector<128x128xbf16>, vector<2x128xf32> -> vector<2x128xf32>
    %c0_3 = arith.constant 0 : index
    %c0_4 = arith.constant 0 : index
    %3 = vector.load %arg2[%c0_3, %c0_4] : memref<2x16xbf16, #tpu.memory_space<vmem>>, vector<2x16xbf16>
    %c0_5 = arith.constant 0 : index
    %c0_6 = arith.constant 0 : index
    %4 = vector.load %arg4[%c0_5, %c0_6] : memref<16x128xbf16, #tpu.memory_space<vmem>>, vector<16x128xbf16>
    %cst_7 = arith.constant dense<0.000000e+00> : vector<2x128xf32>
    %5 = tpu.matmul %3, %4, %cst_7 {dimension_numbers = #tpu.dot_dimension_numbers<[1], [0], [0], [1], [0, 0, 1, 1], [], []>} : vector<2x16xbf16>, vector<16x128xbf16>, vector<2x128xf32> -> vector<2x128xf32>
    %6 = arith.addf %2, %5 : vector<2x128xf32>
    %c0_8 = arith.constant 0 : index
    %c0_9 = arith.constant 0 : index
    %7 = vector.load %arg5[%c0_8, %c0_9] : memref<1x128xf32, #tpu.memory_space<vmem>>, vector<1x128xf32>
    %8 = vector.broadcast %7 : vector<1x128xf32> to vector<2x128xf32>
    %9 = arith.addf %6, %8 : vector<2x128xf32>
    %cst_10 = arith.constant 0.000000e+00 : f32
    %10 = vector.broadcast %cst_10 : f32 to vector<2x128xf32>
    %11 = arith.maximumf %9, %10 : vector<2x128xf32>
    %c0_11 = arith.constant 0 : index
    %c0_12 = arith.constant 0 : index
    %12 = vector.load %arg6[%c0_11, %c0_12] : memref<128x128xf32, #tpu.memory_space<vmem>>, vector<128x128xf32>
    %cst_13 = arith.constant dense<0.000000e+00> : vector<2x128xf32>
    %13 = tpu.matmul %11, %12, %cst_13 {dimension_numbers = #tpu.dot_dimension_numbers<[1], [0], [0], [1], [0, 0, 1, 1], [], []>} : vector<2x128xf32>, vector<128x128xf32>, vector<2x128xf32> -> vector<2x128xf32>
    %c0_14 = arith.constant 0 : index
    %c0_15 = arith.constant 0 : index
    %14 = vector.load %arg7[%c0_14, %c0_15] : memref<1x128xf32, #tpu.memory_space<vmem>>, vector<1x128xf32>
    %15 = vector.broadcast %14 : vector<1x128xf32> to vector<2x128xf32>
    %16 = arith.addf %13, %15 : vector<2x128xf32>
    %cst_16 = arith.constant 0.000000e+00 : f32
    %17 = vector.broadcast %cst_16 : f32 to vector<2x128xf32>
    %18 = arith.maximumf %16, %17 : vector<2x128xf32>
    %c0_17 = arith.constant 0 : index
    %c0_18 = arith.constant 0 : index
    %19 = vector.load %arg8[%c0_17, %c0_18] : memref<1x128xf32, #tpu.memory_space<vmem>>, vector<1x128xf32>
    %cst_19 = arith.constant dense<0.000000e+00> : vector<1x2xf32>
    %20 = tpu.matmul %19, %18, %cst_19 {dimension_numbers = #tpu.dot_dimension_numbers<[1], [1], [0], [0], [0, 0, 1, 0], [], []>} : vector<1x128xf32>, vector<2x128xf32>, vector<1x2xf32> -> vector<1x2xf32>
    %c0_20 = arith.constant 0 : index
    %c0_21 = arith.constant 0 : index
    %21 = vector.load %arg9[%c0_20, %c0_21] : memref<1x2xf32, #tpu.memory_space<vmem>>, vector<1x2xf32>
    tpu.vector_store %arg9[%c0_20, %c0_21], %20 {strides = array<i32>} : memref<1x2xf32, #tpu.memory_space<vmem>>, vector<1x2xf32>,
    return
  }
  func.func @transform_0(%arg0: i32) -> (i32, i32) {
    %c0_i32 = arith.constant 0 : i32
    %c0_i32_0 = arith.constant 0 : i32
    return %arg0, %c0_i32 : i32, i32
  }
  func.func @transform_1(%arg0: i32) -> (i32, i32) {
    %c0_i32 = arith.constant 0 : i32
    %c0_i32_0 = arith.constant 0 : i32
    return %arg0, %c0_i32 : i32, i32
  }
  func.func @transform_2(%arg0: i32) -> (i32, i32) {
    %c0_i32 = arith.constant 0 : i32
    %c0_i32_0 = arith.constant 0 : i32
    %c0_i32_1 = arith.constant 0 : i32
    return %c0_i32, %c0_i32_0 : i32, i32
  }
  func.func @transform_3(%arg0: i32) -> (i32, i32) {
    %c0_i32 = arith.constant 0 : i32
    %c0_i32_0 = arith.constant 0 : i32
    %c0_i32_1 = arith.constant 0 : i32
    return %c0_i32, %c0_i32_0 : i32, i32
  }
  func.func @transform_4(%arg0: i32) -> (i32, i32) {
    %c0_i32 = arith.constant 0 : i32
    %c0_i32_0 = arith.constant 0 : i32
    %c0_i32_1 = arith.constant 0 : i32
    return %c0_i32, %c0_i32_0 : i32, i32
  }
  func.func @transform_5(%arg0: i32) -> (i32, i32) {
    %c0_i32 = arith.constant 0 : i32
    %c0_i32_0 = arith.constant 0 : i32
    %c0_i32_1 = arith.constant 0 : i32
    return %c0_i32, %c0_i32_0 : i32, i32
  }
  func.func @transform_6(%arg0: i32) -> (i32, i32) {
    %c0_i32 = arith.constant 0 : i32
    %c0_i32_0 = arith.constant 0 : i32
    %c0_i32_1 = arith.constant 0 : i32
    return %c0_i32, %c0_i32_0 : i32, i32
  }
  func.func @transform_7(%arg0: i32) -> (i32, i32) {
    %c0_i32 = arith.constant 0 : i32
    %c0_i32_0 = arith.constant 0 : i32
    %c0_i32_1 = arith.constant 0 : i32
    return %c0_i32, %c0_i32_0 : i32, i32
  }
  func.func @transform_8(%arg0: i32) -> (i32, i32) {
    %c0_i32 = arith.constant 0 : i32
    %c0_i32_0 = arith.constant 0 : i32
    return %c0_i32, %arg0 : i32, i32
  }
}

</mosaic_0001>

<bundles_post_ra>
// kernel: tpu_custom_call.1
= control target key start
LH: loop header
LB: loop body
LE: loop exit
PB: predicated region body
PF: predicated region fallthrough
CT: control target
= control target key end

     0   :  { %13 = vsyncpa [#allocation3], 0  ;;  %s803_s0 = inlined_call_operand.hbm [shape: bf16[2,128], index: 0, kind: input, shape index: {}]   ;;  %s804_s1 = inlined_call_operand.vmem [shape: bf16[2,16], index: 1, kind: input, shape index: {}]   ;;  %s805_s2 = inlined_call_operand.hbm [shape: bf16[128,128], index: 2, kind: input, shape index: {}]   ;;  %s806_s3 = inlined_call_operand.vmem [shape: bf16[16,128], index: 3, kind: input, shape index: {}]   ;;  %s807_s4 = inlined_call_operand.vmem [shape: f32[1,128], index: 4, kind: input, shape index: {}]   ;;  %s808_s5 = inlined_call_operand.hbm [shape: f32[128,128], index: 5, kind: input, shape index: {}]   ;;  %s809_s6 = inlined_call_operand.vmem [shape: f32[1,128], index: 6, kind: input, shape index: {}]   ;;  %s810_s7 = inlined_call_operand.vmem [shape: f32[1,128], index: 7, kind: input, shape index: {}]   ;;  %s811_s8 = inlined_call_operand.hbm [shape: f32[1,2], index: 8, kind: output, shape index: {}]  }
   0x1   :  { %14 = vsyncpa [#allocation6], 0 }
   0x2   :  { %15 = vsyncpa [#allocation4], 0  ;;  %s666_s27 = smov [#allocation5]   ;;  %s572_s9 = scalar_lea.hbm %s805_s2, 1024 }
   0x3   :  { %s33_s28 = sshll.u32 %s666_s27, 4  ;;  %p573_p0 = scmp.ne.s32.totalorder %s805_s2, %s572_s9  ;;  %s34_s28 = int_to_ptr.vmem [resolvable:$true] %s33_s28 }
   0x4   :  { %p576_p1 = scmp.lt.u32.totalorder %s572_s9, %s805_s2 }
   0x6   :  { %p578_p2 = pnand %p576_p1, %p573_p0 }
   0x8   :  { %581 = shalt.err (!%p578_p2)
}
   0x9   :  { %s582_s14 = scalar_lea.vmem %s34_s28, 1024  ;;  %p587_p4 = scmp.lt.s32.totalorder %s34_s28, %s34_s28 }
   0xa   :  { %p583_p3 = scmp.ne.s32.totalorder %s34_s28, %s582_s14  ;;  %p588_p5 = scmp.lt.s32.totalorder %s582_s14, %s582_s14 }
   0xc   :  { %p589_p6 = por %p588_p5, %p587_p4 }
   0xe   :  { %p590_p7 = pnand %p589_p6, %p583_p3 }
  0x10   :  { %593 = shalt.err (!%p590_p7)
}
  0x11   :  { %s667_s15 = smov 64   ;;  %s668_s16 = smov 4  }
  0x12   :  { %39 = dma.hbm_to_vmem [thread:$0]  %s805_s2, 1024, %s34_s28, [#allocation6], %s667_s15, %s667_s15, %s668_s16  }
  0x13   :  { %s669_s19 = smov [#allocation2]   ;;  %s670_s21 = smov [#allocation7]  }
  0x14   :  { %s22_s20 = sshll.u32 %s669_s19, 4  ;;  %s49_s22 = sshll.u32 %s670_s21, 4  ;;  %s23_s20 = int_to_ptr.vmem [resolvable:$true] %s22_s20  ;;  %s50_s22 = int_to_ptr.vmem [resolvable:$true] %s49_s22 }
  0x15   :  { %s594_s25 = scalar_lea.hbm %s803_s0, 16 }
  0x16   :  { %p595_p8 = scmp.ne.s32.totalorder %s803_s0, %s594_s25  ;;  %p598_p9 = scmp.lt.u32.totalorder %s594_s25, %s803_s0 }
  0x18   :  { %p600_p10 = pnand %p598_p9, %p595_p8 }
  0x1a   :  { %603 = shalt.err (!%p600_p10)
}
  0x1b   :  { %s604_s2 = scalar_lea.vmem %s23_s20, 16  ;;  %s608_s28 = scalar_lea.vmem %s23_s20, 32 }
  0x1c   :  { %p605_p11 = scmp.ne.s32.totalorder %s23_s20, %s604_s2  ;;  %p609_p12 = scmp.lt.s32.totalorder %s23_s20, %s23_s20 }
  0x1d   :  { %p610_p13 = scmp.lt.s32.totalorder %s608_s28, %s604_s2 }
  0x1f   :  { %p611_p0 = por %p610_p13, %p609_p12 }
  0x21   :  { %p612_p1 = pnand %p611_p0, %p605_p11 }
  0x23   :  { %615 = shalt.err (!%p612_p1)
}
  0x24   :  { %25 = dma.hbm_to_vmem [thread:$0]  %s803_s0, 16, %s23_s20, [#allocation3]  }
  0x25   :  { %s616_s13 = scalar_lea.hbm %s808_s5, 2048 }
  0x26   :  { %p617_p2 = scmp.ne.s32.totalorder %s808_s5, %s616_s13  ;;  %p620_p3 = scmp.lt.u32.totalorder %s616_s13, %s808_s5 }
  0x28   :  { %p622_p4 = pnand %p620_p3, %p617_p2 }
  0x2a   :  { %625 = shalt.err (!%p622_p4)
}
  0x2b   :  { %s626_s18 = scalar_lea.vmem %s50_s22, 2048  ;;  %p631_p6 = scmp.lt.s32.totalorder %s50_s22, %s50_s22 }
  0x2c   :  { %p627_p5 = scmp.ne.s32.totalorder %s50_s22, %s626_s18  ;;  %p632_p7 = scmp.lt.s32.totalorder %s626_s18, %s626_s18 }
  0x2e   :  { %p633_p8 = por %p632_p7, %p631_p6 }
  0x30   :  { %p634_p9 = pnand %p633_p8, %p627_p5 }
  0x32   :  { %637 = shalt.err (!%p634_p9)
}
  0x33   :  { %s671_s0 = smov 128   ;;  %s672_s19 = smov 8  }
  0x34   :  { %55 = dma.hbm_to_vmem [thread:$0]  %s808_s5, 2048, %s50_s22, [#allocation6], %s671_s0, %s671_s0, %s672_s19  }
  0x35   :  { %660 = dma.done.wait [#allocation3], 16  }
  0x36   :  { %661 = vsyncadd [#allocation3], 4294967280 }
  0x37   :  { %662 = dma.done.wait [#allocation6], 3072  }
  0x38   :  { %663 = vsyncadd [#allocation6], 4294964224  ;;  %v673_v0 = vmov 0.0   ;;  %vm674_vm0 = vmmov 0   ;;  %v563_v1 = vld [vmem:[#allocation5] sm:$0xff]   ;;  %v564_v2 = vld [vmem:[#allocation5 + $0x8] sm:$0xff]  }
  0x39   :  { %468 = vmatprep.subr.bf16.mxu1 %v673_v0  ;;  %462 = vmatprep.subr.bf16.mxu0 %v673_v0  ;;  %v565_v3 = vld [vmem:[#allocation5 + $0x10] sm:$0xff]   ;;  %v566_v5 = vld [vmem:[#allocation5 + $0x18] sm:$0xff]   ;;  %vm96_vm1 = vcmask 130048   ;;  %v237_v7 = vld [vmem:[#allocation7] sm:$0xff]  ;;  %v675_v8 = vmov 0.0|0.0   ;;  %s676_s29 = smov [#allocation8]  }
  0x3a   :  { %464 = vmatprep.mubr.msk.bf16.mxu0 %vm674_vm0, %v673_v0  ;;  %484 = vmatprep.mubr.msk.bf16.mxu1 %vm674_vm0, %v673_v0  ;;  %v570_v4 = vld [vmem:[%s806_s3] sm:$0xff]   ;;  %v238_v9 = vld [vmem:[#allocation7 + $0x8] sm:$0xff]  ;;  %v567_v14 = vld [vmem:[#allocation5 + $0x20] sm:$0xff]   ;;  %s410_s30 = sshll.u32 %s676_s29, 4  ;;  %vm402_vm2 = vcmask 8192   ;;  %s411_s30 = int_to_ptr.vmem [resolvable:$true] %s410_s30 }
  0x3b   :  { %469 = vmatpush3.bf16.msra.mxu1 %v563_v1  ;;  %463 = vmatpush3.bf16.msra.mxu0 %v570_v4  ;;  %v87_v6 = vld [vmem:[%s804_s1] sm:$0x1]  ;;  %v240_v11 = vld [vmem:[#allocation7 + $0x18] sm:$0xff]  ;;  %v529_v12 = vpack.c.bf16 %v238_v9, %v237_v7  ;;  %v241_v15 = vld [vmem:[#allocation7 + $0x20] sm:$0xff]  ;;  %s638_s2 = scalar_lea.vmem %s411_s30, 16  ;;  %p643_p11 = scmp.lt.s32.totalorder %s411_s30, %s411_s30 }
  0x3c   :  { %470 = vmatprep.subr.bf16.mxu1 %v673_v0  ;;  %528 = vmatprep.subr.bf16.mxu0 %v675_v8  ;;  %v239_v10 = vld [vmem:[#allocation7 + $0x10] sm:$0xff]  ;;  %v242_v16 = vld [vmem:[#allocation7 + $0x28] sm:$0xff]  ;;  %v244_v20 = vld [vmem:[#allocation7 + $0x38] sm:$0xff]  ;;  %p639_p10 = scmp.ne.s32.totalorder %s411_s30, %s638_s2 }
  0x3d   :  { %v532_v13 = vpack.c.bf16 %v240_v11, %v239_v10  ;;  %v535_v17 = vpack.c.bf16 %v242_v16, %v241_v15  ;;  %v568_v18 = vld [vmem:[#allocation5 + $0x28] sm:$0xff]   ;;  %v243_v19 = vld [vmem:[#allocation7 + $0x30] sm:$0xff]  ;;  %v245_v23 = vld [vmem:[#allocation7 + $0x40] sm:$0xff] }
  0x3e   :  { %465 = vmatmul.mubr.msk.bf16.vlgmr.msra.gmra.mrb[0].mxu0 %vm96_vm1, %v87_v6  ;;  %v538_v21 = vpack.c.bf16 %v244_v20, %v243_v19  ;;  %v569_v22 = vld [vmem:[#allocation5 + $0x30] sm:$0xff]   ;;  %v246_v24 = vld [vmem:[#allocation7 + $0x48] sm:$0xff]  ;;  %v571_v26 = vld [vmem:[#allocation5 + $0x38] sm:$0xff]  }
  0x3f   :  { %471 = vmatpush3.bf16.msra.mxu1 %v564_v2  ;;  %530 = vmatpush3.bf16.msra.mxu0 %v529_v12  ;;  %v541_v25 = vpack.c.bf16 %v246_v24, %v245_v23  ;;  %v247_v27 = vld [vmem:[#allocation7 + $0x50] sm:$0xff]  ;;  %v248_v28 = vld [vmem:[#allocation7 + $0x58] sm:$0xff]  ;;  %v249_v31 = vld [vmem:[#allocation7 + $0x60] sm:$0xff] }
  0x40   :  { %472 = vmatprep.subr.bf16.mxu1 %v673_v0  ;;  %520 = vmatprep.mubr.msk.f32.mxu0 %vm674_vm0, %v673_v0  ;;  %v544_v29 = vpack.c.bf16 %v248_v28, %v247_v27  ;;  %v70_v30 = vld [vmem:[#allocation2] sm:$0x1]  ;;  %v250_v32 = vld [vmem:[#allocation7 + $0x68] sm:$0xff]  ;;  %v251_v34 = vld [vmem:[#allocation7 + $0x70] sm:$0xff] }
  0x41   :  { %531 = vmatprep.subr.bf16.mxu0 %v675_v8  ;;  %v547_v33 = vpack.c.bf16 %v250_v32, %v249_v31  ;;  %v252_v35 = vld [vmem:[#allocation7 + $0x78] sm:$0xff]  ;;  %v430_v42 = vld [vmem:[%s807_s4] ss:$0 sm:$0xff] }
  0x42   :  { %v550_v36 = vpack.c.bf16 %v252_v35, %v251_v34  ;;  %v431_v49 = vld [vmem:[%s809_s6] ss:$0 sm:$0xff]  ;;  %s642_s6 = scalar_lea.vmem %s411_s30, 32 }
  0x43   :  { %473 = vmatpush3.bf16.msra.mxu1 %v565_v3  ;;  %533 = vmatpush3.bf16.msra.mxu0 %v532_v13  ;;  %v331_v54 = vld [vmem:[%s810_s7] sm:$0x1]  ;;  %p644_p12 = scmp.lt.s32.totalorder %s642_s6, %s638_s2 }
  0x44   :  { %474 = vmatprep.subr.bf16.mxu1 %v673_v0  ;;  %534 = vmatprep.subr.bf16.mxu0 %v675_v8 }
  0x45   :  { %p645_p13 = por %p644_p12, %p643_p11 }
  0x47   :  { %475 = vmatpush3.bf16.msra.mxu1 %v566_v5  ;;  %536 = vmatpush3.bf16.msra.mxu0 %v535_v17  ;;  %p646_p0 = pnand %p645_p13, %p639_p10 }
  0x48   :  { %476 = vmatprep.subr.bf16.mxu1 %v673_v0  ;;  %537 = vmatprep.subr.bf16.mxu0 %v675_v8 }
  0x4b   :  { %477 = vmatpush3.bf16.msra.mxu1 %v567_v14  ;;  %539 = vmatpush3.bf16.msra.mxu0 %v538_v21 }
  0x4c   :  { %478 = vmatprep.subr.bf16.mxu1 %v673_v0  ;;  %540 = vmatprep.subr.bf16.mxu0 %v675_v8 }
  0x4f   :  { %479 = vmatpush3.bf16.msra.mxu1 %v568_v18  ;;  %542 = vmatpush3.bf16.msra.mxu0 %v541_v25 }
  0x50   :  { %480 = vmatprep.subr.bf16.mxu1 %v673_v0  ;;  %543 = vmatprep.subr.bf16.mxu0 %v675_v8 }
  0x53   :  { %481 = vmatpush3.bf16.msra.mxu1 %v569_v22  ;;  %545 = vmatpush3.bf16.msra.mxu0 %v544_v29 }
  0x54   :  { %482 = vmatprep.subr.bf16.mxu1 %v673_v0  ;;  %546 = vmatprep.subr.bf16.mxu0 %v675_v8 }
  0x57   :  { %483 = vmatpush3.bf16.msra.mxu1 %v571_v26  ;;  %548 = vmatpush3.bf16.msra.mxu0 %v547_v33 }
  0x58   :  { %549 = vmatprep.subr.bf16.mxu0 %v675_v8 }
  0x5a   :  { %485 = vmatmul.mubr.bf16.vlgmr.msra.gmra.mrb[0].mxu1 %v70_v30 }
  0x5b   :  { %551 = vmatpush3.bf16.msra.mxu0 %v550_v36 }
  0x5c   :  { %523 = vmatprep.subr.mxu0 %v673_v0 }
 0x111   :  { %v134_v37 = vpop.f32.mrb[0].mxu0 }
 0x112   :  { %v466_v38 = vpop.f32.mrb[1].mxu0 }
 0x113   :  { %v137_v39 = vpop.f32.mrb[2].mxu0 }
 0x114   :  { %v467_v40 = vpop.f32.mrb[3].mxu0 }
 0x12d   :  { %v222_v41 = vpop.f32.mrb[0].mxu1 }
 0x12e   :  { %v223_v43 = vadd.f32 %v222_v41, %v134_v37  ;;  %v486_v44 = vpop.f32.mrb[1].mxu1 }
 0x12f   :  { %v225_v45 = vpop.f32.mrb[2].mxu1 }
 0x130   :  { %v235_v46 = vadd.f32 %v430_v42, %v223_v43  ;;  %v487_v47 = vpop.f32.mrb[3].mxu1 }
 0x132   :  { %v236_v48 = vmax.f32 %v235_v46, 0.0 }
 0x134   :  { %521 = vmatmul.mubr.f32.vlgmr.msra.gmra.mrb[4].mxu0 %v236_v48 }
 0x135   :  { %525 = vmatprep.mubr.msk.f32.mxu0 %vm674_vm0, %v673_v0 }
 0x207   :  { %v326_v50 = vpop.f32.mrb[4].mxu0 }
 0x208   :  { %v327_v51 = vadd.f32 %v431_v49, %v326_v50  ;;  %v522_v52 = vpop.f32.mrb[5].mxu0 }
 0x20a   :  { %v330_v53 = vmax.f32 %v327_v51, 0.0 }
 0x20c   :  { %524 = vmatpush3.xpose.msra.mxu0 %v330_v53 }
 0x20f   :  { %526 = vmatmul.mubr.f32.vlgmr.msra.gmra.mrb[6].mxu0 %v331_v54 }
 0x2e2   :  { %v398_v55 = vpop.f32.mrb[6].mxu0 }
 0x2e3   :  { %v527_v56 = vpop.f32.mrb[7].mxu0  ;;  %403 = vst.msk [vmem:[#allocation8] sm:$0x1] %vm402_vm2, %v398_v55 }
 0x2e4   :  { %649 = shalt.err (!%p646_p0)
}
 0x2e5   :  { %s650_s7 = scalar_lea.hbm %s811_s8, 16 }
 0x2e6   :  { %p651_p1 = scmp.ne.s32.totalorder %s811_s8, %s650_s7  ;;  %p654_p2 = scmp.lt.u32.totalorder %s650_s7, %s811_s8 }
 0x2e8   :  { %p656_p3 = pnand %p654_p2, %p651_p1 }
 0x2ea   :  { %659 = shalt.err (!%p656_p3)
}
 0x2eb   :  { %413 = dma.vmem_to_hbm [thread:$0]  %s411_s30, 16, %s811_s8, [#allocation4]  }
 0x2ec   :  { %664 = dma.done.wait [#allocation4], 16  }
 0x2ed   :  { %665 = vsyncadd [#allocation4], 4294967280 }
 0x2ee   :  { %417 = vsyncpa [#allocation3], 1 }
 0x2ef   :  { %418 = vsyncpa [#allocation6], 1 }
 0x2f0   :  { %419 = vsyncpa [#allocation4], 1 }

// kernel: tpu_custom_call.1
= control target key start
LH: loop header
LB: loop body
LE: loop exit
PB: predicated region body
PF: predicated region fallthrough
CT: control target
= control target key end

     0   :  { %13 = vsyncpa [#allocation3], 0  ;;  %s803_s0 = inlined_call_operand.hbm [shape: bf16[2,128], index: 0, kind: input, shape index: {}]   ;;  %s804_s1 = inlined_call_operand.vmem [shape: bf16[2,16], index: 1, kind: input, shape index: {}]   ;;  %s805_s2 = inlined_call_operand.hbm [shape: bf16[128,128], index: 2, kind: input, shape index: {}]   ;;  %s806_s3 = inlined_call_operand.vmem [shape: bf16[16,128], index: 3, kind: input, shape index: {}]   ;;  %s807_s4 = inlined_call_operand.vmem [shape: f32[1,128], index: 4, kind: input, shape index: {}]   ;;  %s808_s5 = inlined_call_operand.hbm [shape: f32[128,128], index: 5, kind: input, shape index: {}]   ;;  %s809_s6 = inlined_call_operand.vmem [shape: f32[1,128], index: 6, kind: input, shape index: {}]   ;;  %s810_s7 = inlined_call_operand.vmem [shape: f32[1,128], index: 7, kind: input, shape index: {}]   ;;  %s811_s8 = inlined_call_operand.hbm [shape: f32[1,2], index: 8, kind: output, shape index: {}]  }
   0x1   :  { %14 = vsyncpa [#allocation6], 0 }
   0x2   :  { %15 = vsyncpa [#allocation4], 0  ;;  %s666_s27 = smov [#allocation5]   ;;  %s572_s9 = scalar_lea.hbm %s805_s2, 1024 }
   0x3   :  { %s33_s28 = sshll.u32 %s666_s27, 4  ;;  %p573_p0 = scmp.ne.s32.totalorder %s805_s2, %s572_s9  ;;  %s34_s28 = int_to_ptr.vmem [resolvable:$true] %s33_s28 }
   0x4   :  { %p576_p1 = scmp.lt.u32.totalorder %s572_s9, %s805_s2 }
   0x6   :  { %p578_p2 = pnand %p576_p1, %p573_p0 }
   0x8   :  { %581 = shalt.err (!%p578_p2)
}
   0x9   :  { %s582_s14 = scalar_lea.vmem %s34_s28, 1024  ;;  %p587_p4 = scmp.lt.s32.totalorder %s34_s28, %s34_s28 }
   0xa   :  { %p583_p3 = scmp.ne.s32.totalorder %s34_s28, %s582_s14  ;;  %p588_p5 = scmp.lt.s32.totalorder %s582_s14, %s582_s14 }
   0xc   :  { %p589_p6 = por %p588_p5, %p587_p4 }
   0xe   :  { %p590_p7 = pnand %p589_p6, %p583_p3 }
  0x10   :  { %593 = shalt.err (!%p590_p7)
}
  0x11   :  { %s667_s15 = smov 64   ;;  %s668_s16 = smov 4  }
  0x12   :  { %39 = dma.hbm_to_vmem [thread:$0]  %s805_s2, 1024, %s34_s28, [#allocation6], %s667_s15, %s667_s15, %s668_s16  }
  0x13   :  { %s669_s19 = smov [#allocation2]   ;;  %s670_s21 = smov [#allocation7]  }
  0x14   :  { %s22_s20 = sshll.u32 %s669_s19, 4  ;;  %s49_s22 = sshll.u32 %s670_s21, 4  ;;  %s23_s20 = int_to_ptr.vmem [resolvable:$true] %s22_s20  ;;  %s50_s22 = int_to_ptr.vmem [resolvable:$true] %s49_s22 }
  0x15   :  { %s594_s25 = scalar_lea.hbm %s803_s0, 16 }
  0x16   :  { %p595_p8 = scmp.ne.s32.totalorder %s803_s0, %s594_s25  ;;  %p598_p9 = scmp.lt.u32.totalorder %s594_s25, %s803_s0 }
  0x18   :  { %p600_p10 = pnand %p598_p9, %p595_p8 }
  0x1a   :  { %603 = shalt.err (!%p600_p10)
}
  0x1b   :  { %s604_s2 = scalar_lea.vmem %s23_s20, 16  ;;  %s608_s28 = scalar_lea.vmem %s23_s20, 32 }
  0x1c   :  { %p605_p11 = scmp.ne.s32.totalorder %s23_s20, %s604_s2  ;;  %p609_p12 = scmp.lt.s32.totalorder %s23_s20, %s23_s20 }
  0x1d   :  { %p610_p13 = scmp.lt.s32.totalorder %s608_s28, %s604_s2 }
  0x1f   :  { %p611_p0 = por %p610_p13, %p609_p12 }
  0x21   :  { %p612_p1 = pnand %p611_p0, %p605_p11 }
  0x23   :  { %615 = shalt.err (!%p612_p1)
}
  0x24   :  { %25 = dma.hbm_to_vmem [thread:$0]  %s803_s0, 16, %s23_s20, [#allocation3]  }
  0x25   :  { %s616_s13 = scalar_lea.hbm %s808_s5, 2048 }
  0x26   :  { %p617_p2 = scmp.ne.s32.totalorder %s808_s5, %s616_s13  ;;  %p620_p3 = scmp.lt.u32.totalorder %s616_s13, %s808_s5 }
  0x28   :  { %p622_p4 = pnand %p620_p3, %p617_p2 }
  0x2a   :  { %625 = shalt.err (!%p622_p4)
}
  0x2b   :  { %s626_s18 = scalar_lea.vmem %s50_s22, 2048  ;;  %p631_p6 = scmp.lt.s32.totalorder %s50_s22, %s50_s22 }
  0x2c   :  { %p627_p5 = scmp.ne.s32.totalorder %s50_s22, %s626_s18  ;;  %p632_p7 = scmp.lt.s32.totalorder %s626_s18, %s626_s18 }
  0x2e   :  { %p633_p8 = por %p632_p7, %p631_p6 }
  0x30   :  { %p634_p9 = pnand %p633_p8, %p627_p5 }
  0x32   :  { %637 = shalt.err (!%p634_p9)
}
  0x33   :  { %s671_s0 = smov 128   ;;  %s672_s19 = smov 8  }
  0x34   :  { %55 = dma.hbm_to_vmem [thread:$0]  %s808_s5, 2048, %s50_s22, [#allocation6], %s671_s0, %s671_s0, %s672_s19  }
  0x35   :  { %660 = dma.done.wait [#allocation3], 16  }
  0x36   :  { %661 = vsyncadd [#allocation3], 4294967280 }
  0x37   :  { %662 = dma.done.wait [#allocation6], 3072  }
  0x38   :  { %663 = vsyncadd [#allocation6], 4294964224  ;;  %v673_v0 = vmov 0.0   ;;  %vm674_vm0 = vmmov 0   ;;  %v563_v1 = vld [vmem:[#allocation5] sm:$0xff]   ;;  %v564_v2 = vld [vmem:[#allocation5 + $0x8] sm:$0xff]  }
  0x39   :  { %468 = vmatprep.subr.bf16.mxu1 %v673_v0  ;;  %462 = vmatprep.subr.bf16.mxu0 %v673_v0  ;;  %v565_v3 = vld [vmem:[#allocation5 + $0x10] sm:$0xff]   ;;  %v566_v5 = vld [vmem:[#allocation5 + $0x18] sm:$0xff]   ;;  %vm96_vm1 = vcmask 130048   ;;  %v237_v7 = vld [vmem:[#allocation7] sm:$0xff]  ;;  %v675_v8 = vmov 0.0|0.0   ;;  %s676_s29 = smov [#allocation8]  }
  0x3a   :  { %464 = vmatprep.mubr.msk.bf16.mxu0 %vm674_vm0, %v673_v0  ;;  %484 = vmatprep.mubr.msk.bf16.mxu1 %vm674_vm0, %v673_v0  ;;  %v570_v4 = vld [vmem:[%s806_s3] sm:$0xff]   ;;  %v238_v9 = vld [vmem:[#allocation7 + $0x8] sm:$0xff]  ;;  %v567_v14 = vld [vmem:[#allocation5 + $0x20] sm:$0xff]   ;;  %s410_s30 = sshll.u32 %s676_s29, 4  ;;  %vm402_vm2 = vcmask 8192   ;;  %s411_s30 = int_to_ptr.vmem [resolvable:$true] %s410_s30 }
  0x3b   :  { %469 = vmatpush3.bf16.msra.mxu1 %v563_v1  ;;  %463 = vmatpush3.bf16.msra.mxu0 %v570_v4  ;;  %v87_v6 = vld [vmem:[%s804_s1] sm:$0x1]  ;;  %v240_v11 = vld [vmem:[#allocation7 + $0x18] sm:$0xff]  ;;  %v529_v12 = vpack.c.bf16 %v238_v9, %v237_v7  ;;  %v241_v15 = vld [vmem:[#allocation7 + $0x20] sm:$0xff]  ;;  %s638_s2 = scalar_lea.vmem %s411_s30, 16  ;;  %p643_p11 = scmp.lt.s32.totalorder %s411_s30, %s411_s30 }
  0x3c   :  { %470 = vmatprep.subr.bf16.mxu1 %v673_v0  ;;  %528 = vmatprep.subr.bf16.mxu0 %v675_v8  ;;  %v239_v10 = vld [vmem:[#allocation7 + $0x10] sm:$0xff]  ;;  %v242_v16 = vld [vmem:[#allocation7 + $0x28] sm:$0xff]  ;;  %v244_v20 = vld [vmem:[#allocation7 + $0x38] sm:$0xff]  ;;  %p639_p10 = scmp.ne.s32.totalorder %s411_s30, %s638_s2 }
  0x3d   :  { %v532_v13 = vpack.c.bf16 %v240_v11, %v239_v10  ;;  %v535_v17 = vpack.c.bf16 %v242_v16, %v241_v15  ;;  %v568_v18 = vld [vmem:[#allocation5 + $0x28] sm:$0xff]   ;;  %v243_v19 = vld [vmem:[#allocation7 + $0x30] sm:$0xff]  ;;  %v245_v23 = vld [vmem:[#allocation7 + $0x40] sm:$0xff] }
  0x3e   :  { %465 = vmatmul.mubr.msk.bf16.vlgmr.msra.gmra.mrb[0].mxu0 %vm96_vm1, %v87_v6  ;;  %v538_v21 = vpack.c.bf16 %v244_v20, %v243_v19  ;;  %v569_v22 = vld [vmem:[#allocation5 + $0x30] sm:$0xff]   ;;  %v246_v24 = vld [vmem:[#allocation7 + $0x48] sm:$0xff]  ;;  %v571_v26 = vld [vmem:[#allocation5 + $0x38] sm:$0xff]  }
  0x3f   :  { %471 = vmatpush3.bf16.msra.mxu1 %v564_v2  ;;  %530 = vmatpush3.bf16.msra.mxu0 %v529_v12  ;;  %v541_v25 = vpack.c.bf16 %v246_v24, %v245_v23  ;;  %v247_v27 = vld [vmem:[#allocation7 + $0x50] sm:$0xff]  ;;  %v248_v28 = vld [vmem:[#allocation7 + $0x58] sm:$0xff]  ;;  %v249_v31 = vld [vmem:[#allocation7 + $0x60] sm:$0xff] }
  0x40   :  { %472 = vmatprep.subr.bf16.mxu1 %v673_v0  ;;  %520 = vmatprep.mubr.msk.f32.mxu0 %vm674_vm0, %v673_v0  ;;  %v544_v29 = vpack.c.bf16 %v248_v28, %v247_v27  ;;  %v70_v30 = vld [vmem:[#allocation2] sm:$0x1]  ;;  %v250_v32 = vld [vmem:[#allocation7 + $0x68] sm:$0xff]  ;;  %v251_v34 = vld [vmem:[#allocation7 + $0x70] sm:$0xff] }
  0x41   :  { %531 = vmatprep.subr.bf16.mxu0 %v675_v8  ;;  %v547_v33 = vpack.c.bf16 %v250_v32, %v249_v31  ;;  %v252_v35 = vld [vmem:[#allocation7 + $0x78] sm:$0xff]  ;;  %v430_v42 = vld [vmem:[%s807_s4] ss:$0 sm:$0xff] }
  0x42   :  { %v550_v36 = vpack.c.bf16 %v252_v35, %v251_v34  ;;  %v431_v49 = vld [vmem:[%s809_s6] ss:$0 sm:$0xff]  ;;  %s642_s6 = scalar_lea.vmem %s411_s30, 32 }
  0x43   :  { %473 = vmatpush3.bf16.msra.mxu1 %v565_v3  ;;  %533 = vmatpush3.bf16.msra.mxu0 %v532_v13  ;;  %v331_v54 = vld [vmem:[%s810_s7] sm:$0x1]  ;;  %p644_p12 = scmp.lt.s32.totalorder %s642_s6, %s638_s2 }
  0x44   :  { %474 = vmatprep.subr.bf16.mxu1 %v673_v0  ;;  %534 = vmatprep.subr.bf16.mxu0 %v675_v8 }
  0x45   :  { %p645_p13 = por %p644_p12, %p643_p11 }
  0x47   :  { %475 = vmatpush3.bf16.msra.mxu1 %v566_v5  ;;  %536 = vmatpush3.bf16.msra.mxu0 %v535_v17  ;;  %p646_p0 = pnand %p645_p13, %p639_p10 }
  0x48   :  { %476 = vmatprep.subr.bf16.mxu1 %v673_v0  ;;  %537 = vmatprep.subr.bf16.mxu0 %v675_v8 }
  0x4b   :  { %477 = vmatpush3.bf16.msra.mxu1 %v567_v14  ;;  %539 = vmatpush3.bf16.msra.mxu0 %v538_v21 }
  0x4c   :  { %478 = vmatprep.subr.bf16.mxu1 %v673_v0  ;;  %540 = vmatprep.subr.bf16.mxu0 %v675_v8 }
  0x4f   :  { %479 = vmatpush3.bf16.msra.mxu1 %v568_v18  ;;  %542 = vmatpush3.bf16.msra.mxu0 %v541_v25 }
  0x50   :  { %480 = vmatprep.subr.bf16.mxu1 %v673_v0  ;;  %543 = vmatprep.subr.bf16.mxu0 %v675_v8 }
  0x53   :  { %481 = vmatpush3.bf16.msra.mxu1 %v569_v22  ;;  %545 = vmatpush3.bf16.msra.mxu0 %v544_v29 }
  0x54   :  { %482 = vmatprep.subr.bf16.mxu1 %v673_v0  ;;  %546 = vmatprep.subr.bf16.mxu0 %v675_v8 }
  0x57   :  { %483 = vmatpush3.bf16.msra.mxu1 %v571_v26  ;;  %548 = vmatpush3.bf16.msra.mxu0 %v547_v33 }
  0x58   :  { %549 = vmatprep.subr.bf16.mxu0 %v675_v8 }
  0x5a   :  { %485 = vmatmul.mubr.bf16.vlgmr.msra.gmra.mrb[0].mxu1 %v70_v30 }
  0x5b   :  { %551 = vmatpush3.bf16.msra.mxu0 %v550_v36 }
  0x5c   :  { %523 = vmatprep.subr.mxu0 %v673_v0 }
 0x111   :  { %v134_v37 = vpop.f32.mrb[0].mxu0 }
 0x112   :  { %v466_v38 = vpop.f32.mrb[1].mxu0 }
 0x113   :  { %v137_v39 = vpop.f32.mrb[2].mxu0 }
 0x114   :  { %v467_v40 = vpop.f32.mrb[3].mxu0 }
 0x12d   :  { %v222_v41 = vpop.f32.mrb[0].mxu1 }
 0x12e   :  { %v223_v43 = vadd.f32 %v222_v41, %v134_v37  ;;  %v486_v44 = vpop.f32.mrb[1].mxu1 }
 0x12f   :  { %v225_v45 = vpop.f32.mrb[2].mxu1 }
 0x130   :  { %v235_v46 = vadd.f32 %v430_v42, %v223_v43  ;;  %v487_v47 = vpop.f32.mrb[3].mxu1 }
 0x132   :  { %v236_v48 = vmax.f32 %v235_v46, 0.0 }
 0x134   :  { %521 = vmatmul.mubr.f32.vlgmr.msra.gmra.mrb[4].mxu0 %v236_v48 }
 0x135   :  { %525 = vmatprep.mubr.msk.f32.mxu0 %vm674_vm0, %v673_v0 }
 0x207   :  { %v326_v50 = vpop.f32.mrb[4].mxu0 }
 0x208   :  { %v327_v51 = vadd.f32 %v431_v49, %v326_v50  ;;  %v522_v52 = vpop.f32.mrb[5].mxu0 }
 0x20a   :  { %v330_v53 = vmax.f32 %v327_v51, 0.0 }
 0x20c   :  { %524 = vmatpush3.xpose.msra.mxu0 %v330_v53 }
 0x20f   :  { %526 = vmatmul.mubr.f32.vlgmr.msra.gmra.mrb[6].mxu0 %v331_v54 }
 0x2e2   :  { %v398_v55 = vpop.f32.mrb[6].mxu0 }
 0x2e3   :  { %v527_v56 = vpop.f32.mrb[7].mxu0  ;;  %403 = vst.msk [vmem:[#allocation8] sm:$0x1] %vm402_vm2, %v398_v55 }
 0x2e4   :  { %649 = shalt.err (!%p646_p0)
}
 0x2e5   :  { %s650_s7 = scalar_lea.hbm %s811_s8, 16 }
 0x2e6   :  { %p651_p1 = scmp.ne.s32.totalorder %s811_s8, %s650_s7  ;;  %p654_p2 = scmp.lt.u32.totalorder %s650_s7, %s811_s8 }
 0x2e8   :  { %p656_p3 = pnand %p654_p2, %p651_p1 }
 0x2ea   :  { %659 = shalt.err (!%p656_p3)
}
 0x2eb   :  { %413 = dma.vmem_to_hbm [thread:$0]  %s411_s30, 16, %s811_s8, [#allocation4]  }
 0x2ec   :  { %664 = dma.done.wait [#allocation4], 16  }
 0x2ed   :  { %665 = vsyncadd [#allocation4], 4294967280 }
 0x2ee   :  { %417 = vsyncpa [#allocation3], 1 }
 0x2ef   :  { %418 = vsyncpa [#allocation6], 1 }
 0x2f0   :  { %419 = vsyncpa [#allocation4], 1 }

</bundles_post_ra>
